<compile_context>
chip_gen: v5e
topology: v5e:2x2
jax: 0.10.0
libtpu: 0.0.40
codegen_flags: <defaults>
</compile_context>

<pallas_src>
import functools

import jax
import jax.numpy as jnp
from jax.experimental import pallas as pl
from jax.experimental.pallas import tpu as pltpu

# ---------------------------------------------------------------------------
# config (small, consistent with the module's forward)
# ---------------------------------------------------------------------------
N_LAYERS = 2
N_HEAD = 2
D_K = 8
D_V = 8
D_MODEL = 32
D_INNER = 64
LN_EPS = 1e-5
MASK_BIAS = -1e30          # finite "-inf": exp underflows to exactly 0 in f32

HDK = N_HEAD * D_K                     # 16
HDV = N_HEAD * D_V                     # 16
QKV_W = 2 * HDK + HDV                  # fused q|k|v projection width (48)
PACK_W = QKV_W + D_INNER               # packed-parameter lane width (112)
WB_R0 = D_MODEL                        # row offset of [wfc ; w2] block (32)
VEC_R0 = D_MODEL + HDV + D_INNER       # row offset of packed vectors (112)
PACK_ROWS = VEC_R0 + 8                 # 120


def _layer_norm(y, gamma, beta):
    """PyTorch LayerNorm over last dim (biased variance, eps=1e-5)."""
    mu = jnp.mean(y, axis=-1, keepdims=True)
    var = jnp.mean((y - mu) ** 2, axis=-1, keepdims=True)
    return (y - mu) * jax.lax.rsqrt(var + LN_EPS) * gamma + beta


# ---------------------------------------------------------------------------
# fused _EncoderLayer kernel
# ---------------------------------------------------------------------------
def _encoder_layer_kernel(
    x_ref,        # (B*L, D)            activations, flattened tokens
    mpack_ref,    # (B*L, B*L + 1)      [additive score bias | non-pad mask]
    wpack_ref,    # (PACK_ROWS, PACK_W) all layer parameters, packed
    out_ref,      # (B*L, D)
    attn_ref,     # (H * B*L, L)        attention probs, head-major rows
    ocat_ref,     # scratch (B*L, H*Dv) concatenated head outputs
    *, bsz, seq,
):
    n = bsz * seq
    x = x_ref[...]                                     # (N, D)
    bias2d = mpack_ref[:, 0:n]                         # (N, N) additive mask bias
    npm = mpack_ref[:, n:n + 1]                        # (N, 1) non-pad mask

    # ---- packed parameter views (static, tile-aligned sublane offsets) ----
    w_qkv = wpack_ref[0:D_MODEL, 0:QKV_W]                              # (32, 48)
    w_1   = wpack_ref[0:D_MODEL, QKV_W:QKV_W + D_INNER]                # (32, 64)
    w_fc  = wpack_ref[WB_R0:WB_R0 + HDV, 0:D_MODEL]                    # (16, 32)
    w_2   = wpack_ref[WB_R0 + HDV:WB_R0 + HDV + D_INNER, 0:D_MODEL]    # (64, 32)
    b_qkv = wpack_ref[VEC_R0 + 0:VEC_R0 + 1, 0:QKV_W]
    b_1   = wpack_ref[VEC_R0 + 1:VEC_R0 + 2, 0:D_INNER]
    b_fc  = wpack_ref[VEC_R0 + 2:VEC_R0 + 3, 0:D_MODEL]
    ln1_g = wpack_ref[VEC_R0 + 3:VEC_R0 + 4, 0:D_MODEL]
    ln1_b = wpack_ref[VEC_R0 + 4:VEC_R0 + 5, 0:D_MODEL]
    b_2   = wpack_ref[VEC_R0 + 5:VEC_R0 + 6, 0:D_MODEL]
    ln2_g = wpack_ref[VEC_R0 + 6:VEC_R0 + 7, 0:D_MODEL]
    ln2_b = wpack_ref[VEC_R0 + 7:VEC_R0 + 8, 0:D_MODEL]

    inv_temp = 1.0 / (D_K ** 0.5)

    # ---- fused QKV projection: one MXU matmul ----
    qkv = jnp.dot(x, w_qkv, preferred_element_type=jnp.float32) + b_qkv   # (N, 48)
    q = qkv[:, 0:HDK]
    k = qkv[:, HDK:2 * HDK]
    v = qkv[:, 2 * HDK:2 * HDK + HDV]

    # ---- per-head attention, all 2-D (no per-head reshapes / transposes) ----
    attn_parts = []
    for h in range(N_HEAD):                       # fully unrolled, N_HEAD == 2
        qh = q[:, h * D_K:(h + 1) * D_K]          # (N, Dk) static 2-D lane slice
        kh = k[:, h * D_K:(h + 1) * D_K]
        vh = v[:, h * D_V:(h + 1) * D_V]

        # Scores on the flattened token axis; bias2d masks padded keys AND
        # cross-batch pairs, so a plain 2-D matmul replaces a batched einsum.
        s = jnp.einsum("nd,md->nm", qh, kh,
                       preferred_element_type=jnp.float32)            # (N, N)
        s = s * inv_temp + bias2d

        s_max = jnp.max(s, axis=-1, keepdims=True)
        p = jnp.exp(s - s_max)
        p = p / jnp.sum(p, axis=-1, keepdims=True)   # exact divide (p is exported)

        # Fold away the cross-batch columns (exactly 0 after masking) to get
        # the per-batch (L) attention rows for the output.
        folded = p[:, 0:seq]
        for c in range(1, bsz):
            folded = folded + p[:, c * seq:(c + 1) * seq]
        attn_parts.append(folded)                                      # (N, L)

        # Head output goes straight into the concatenated fc input slab.
        ocat_ref[:, h * D_V:(h + 1) * D_V] = jnp.dot(
            p, vh, preferred_element_type=jnp.float32)                 # (N, Dv)

    # single store of both heads' attention probabilities
    attn_ref[...] = jnp.concatenate(attn_parts, axis=0)                # (H*N, L)

    # ---- single output projection over both heads (K = H*Dv) ----
    mha = jnp.dot(ocat_ref[...], w_fc, preferred_element_type=jnp.float32) + b_fc

    # residual + LayerNorm, then non-pad mask
    y = _layer_norm(mha + x, ln1_g, ln1_b) * npm

    # ---- position-wise FFN (conv1d k=1 == per-token linear) ----
    h1 = jnp.maximum(
        jnp.dot(y, w_1, preferred_element_type=jnp.float32) + b_1, 0.0)
    ff = jnp.dot(h1, w_2, preferred_element_type=jnp.float32) + b_2

    out_ref[...] = _layer_norm(ff + y, ln2_g, ln2_b) * npm


def _encoder_layer(x_flat, mask_pack, wpack, *, bsz, seq):
    """One fused _EncoderLayer forward. x_flat: (B*L, D)."""
    n = bsz * seq
    kernel = functools.partial(_encoder_layer_kernel, bsz=bsz, seq=seq)
    out, attn = pl.pallas_call(
        kernel,
        out_shape=(jax.ShapeDtypeStruct((n, D_MODEL), jnp.float32),
                   jax.ShapeDtypeStruct((N_HEAD * n, seq), jnp.float32)),
        scratch_shapes=[pltpu.VMEM((n, HDV), jnp.float32)],
    )(x_flat, mask_pack, wpack)
    return out, attn


# ---------------------------------------------------------------------------
# wrapper-side packing (layout plumbing, done once per forward / per layer)
# ---------------------------------------------------------------------------
def _pack_mask(valid):
    """valid: (B, L) float 1/0  ->  (B*L, B*L + 1) [score bias | non-pad mask]."""
    bsz, seq = valid.shape
    n = bsz * seq
    same_batch = jnp.repeat(jnp.repeat(jnp.eye(bsz, dtype=jnp.float32),
                                       seq, axis=0), seq, axis=1)       # (N, N)
    allowed = same_batch * valid.reshape(1, n)
    bias2d = jnp.where(allowed > 0.5, 0.0, MASK_BIAS).astype(jnp.float32)
    npm = valid.reshape(n, 1)
    return jnp.concatenate([bias2d, npm], axis=1).astype(jnp.float32)


def _pack_params(p):
    """Pack all per-layer parameters into one (PACK_ROWS, PACK_W) slab."""
    wqkv = jnp.concatenate([p["wq"], p["wk"], p["wv"]], axis=1)        # (32, 48)
    wA = jnp.concatenate([wqkv, p["w1"]], axis=1)                      # (32, 112)
    wB = jnp.concatenate([p["wfc"], p["w2"]], axis=0)                  # (80, 32)
    bqkv = jnp.concatenate([p["bq"], p["bk"], p["bv"]], axis=1)        # (1, 48)

    def row(vec):
        return jnp.pad(vec, ((0, 0), (0, PACK_W - vec.shape[1])))

    vec_rows = jnp.concatenate(
        [row(bqkv), row(p["b1"]), row(p["bfc"]),
         row(p["ln1_g"]), row(p["ln1_b"]), row(p["b2"]),
         row(p["ln2_g"]), row(p["ln2_b"])], axis=0)                    # (8, 112)

    wA_p = jnp.pad(wA, ((0, 0), (0, PACK_W - wA.shape[1])))
    wB_p = jnp.pad(wB, ((0, 0), (0, PACK_W - wB.shape[1])))
    return jnp.concatenate([wA_p, wB_p, vec_rows], axis=0)             # (120, 112)


def transformer_encoder(input_feats, num_objs, layer_params):
    """_TransformerEncoder.forward.  input_feats: (#total_box, D); num_objs: list[int]."""
    bsz = len(num_objs)
    pad_len = max(num_objs)

    # pad_sequence(batch_first=True)
    segs, off = [], 0
    for nb in num_objs:
        segs.append(jnp.pad(input_feats[off:off + nb], ((0, pad_len - nb), (0, 0))))
        off += nb
    x = jnp.stack(segs)                                                # (B, L, D)

    valid = (jnp.arange(pad_len)[None, :] <
             jnp.asarray(num_objs)[:, None]).astype(jnp.float32)       # (B, L)
    mask_pack = _pack_mask(valid)                                      # reused by all layers

    x_flat = x.reshape(bsz * pad_len, D_MODEL)
    attn = None
    for p in layer_params:
        wpack = _pack_params(p)
        x_flat, attn = _encoder_layer(x_flat, mask_pack, wpack, bsz=bsz, seq=pad_len)

    enc = x_flat.reshape(bsz, pad_len, D_MODEL)
    # enc_output[non_pad_mask.squeeze(-1)]  (num_objs are static Python ints)
    out = jnp.concatenate([enc[b, :num_objs[b]] for b in range(bsz)], axis=0)
    # last layer's attn in torch layout (n_head * bsz, L, L), head-major
    attn = attn.reshape(N_HEAD * bsz, pad_len, pad_len)
    return out, attn


# ---------------------------------------------------------------------------
# deterministic parameter init (shapes from the module __init__)
# ---------------------------------------------------------------------------
def make_params(key):
    ks = jax.random.split(key, 8)
    std_qk = (2.0 / (D_MODEL + D_K)) ** 0.5
    std_v = (2.0 / (D_MODEL + D_V)) ** 0.5

    def lin(k, shape, std):
        return (std * jax.random.normal(k, shape)).astype(jnp.float32)

    return {
        # projection weights stored as (in, out) so y = x @ W + b
        "wq": lin(ks[0], (D_MODEL, HDK), std_qk),
        "bq": jnp.zeros((1, HDK), jnp.float32),
        "wk": lin(ks[1], (D_MODEL, HDK), std_qk),
        "bk": jnp.zeros((1, HDK), jnp.float32),
        "wv": lin(ks[2], (D_MODEL, HDV), std_v),
        "bv": jnp.zeros((1, HDV), jnp.float32),
        "wfc": lin(ks[3], (HDV, D_MODEL), (2.0 / (HDV + D_MODEL)) ** 0.5),
        "bfc": jnp.zeros((1, D_MODEL), jnp.float32),
        "ln1_g": jnp.ones((1, D_MODEL), jnp.float32),
        "ln1_b": jnp.zeros((1, D_MODEL), jnp.float32),
        # conv1d(kernel=1) weights as (in, out)
        "w1": lin(ks[4], (D_MODEL, D_INNER), 0.05),
        "b1": lin(ks[5], (1, D_INNER), 0.05),
        "w2": lin(ks[6], (D_INNER, D_MODEL), 0.05),
        "b2": lin(ks[7], (1, D_MODEL), 0.05),
        "ln2_g": jnp.ones((1, D_MODEL), jnp.float32),
        "ln2_b": jnp.zeros((1, D_MODEL), jnp.float32),
    }


# ---------------------------------------------------------------------------
# pure-JAX reference mirroring the PyTorch forward (dropout = identity)
# ---------------------------------------------------------------------------
def _reference_layer(x, attn_mask_bool, non_pad_mask, p):
    bsz, seq, _ = x.shape
    residual = x
    q = x @ p["wq"] + p["bq"]
    k = x @ p["wk"] + p["bk"]
    v = x @ p["wv"] + p["bv"]
    q = q.reshape(bsz, seq, N_HEAD, D_K).transpose(2, 0, 1, 3).reshape(-1, seq, D_K)
    k = k.reshape(bsz, seq, N_HEAD, D_K).transpose(2, 0, 1, 3).reshape(-1, seq, D_K)
    v = v.reshape(bsz, seq, N_HEAD, D_V).transpose(2, 0, 1, 3).reshape(-1, seq, D_V)
    mask = jnp.tile(attn_mask_bool, (N_HEAD, 1, 1))
    s = jnp.einsum("bqd,bkd->bqk", q, k) / (D_K ** 0.5)
    s = jnp.where(mask, -jnp.inf, s)
    attn = jax.nn.softmax(s, axis=2)
    out = jnp.einsum("bqk,bkd->bqd", attn, v)
    out = out.reshape(N_HEAD, bsz, seq, D_V).transpose(1, 2, 0, 3).reshape(bsz, seq, -1)
    out = out @ p["wfc"] + p["bfc"]
    y = _layer_norm(out + residual, p["ln1_g"], p["ln1_b"]) * non_pad_mask
    h1 = jnp.maximum(y @ p["w1"] + p["b1"], 0.0)
    ff = h1 @ p["w2"] + p["b2"]
    z = _layer_norm(ff + y, p["ln2_g"], p["ln2_b"]) * non_pad_mask
    return z, attn


def reference_encoder(input_feats, num_objs, layer_params):
    bsz, pad_len = len(num_objs), max(num_objs)
    segs, off = [], 0
    for nb in num_objs:
        segs.append(jnp.pad(input_feats[off:off + nb], ((0, pad_len - nb), (0, 0))))
        off += nb
    x = jnp.stack(segs)
    num = jnp.asarray(num_objs)[:, None]
    key_pad = jnp.arange(pad_len)[None, :] >= num
    attn_mask = jnp.broadcast_to(key_pad[:, None, :], (bsz, pad_len, pad_len))
    non_pad_mask = (jnp.arange(pad_len)[None, :] < num).astype(jnp.float32)[..., None]
    attn = None
    for p in layer_params:
        x, attn = _reference_layer(x, attn_mask, non_pad_mask, p)
    out = jnp.concatenate([x[b, :num_objs[b]] for b in range(bsz)], axis=0)
    return out, attn


if __name__ == "__main__":
    key = jax.random.PRNGKey(0)
    k_x, k_p = jax.random.split(key)

    num_objs = [8, 6]                       # second image has 2 padded positions
    total = sum(num_objs)
    input_feats = jax.random.normal(k_x, (total, D_MODEL), dtype=jnp.float32)
    layer_params = [make_params(k) for k in jax.random.split(k_p, N_LAYERS)]

    enc_out, attn = transformer_encoder(input_feats, num_objs, layer_params)
    jax.block_until_ready(enc_out)
    jax.block_until_ready(attn)

    ref_out, ref_attn = reference_encoder(input_feats, num_objs, layer_params)
    assert enc_out.shape == (total, D_MODEL)
    assert jnp.allclose(enc_out, ref_out, atol=2e-3, rtol=2e-3), "enc_output mismatch"
    assert jnp.allclose(attn, ref_attn, atol=2e-3, rtol=2e-3), "attn mismatch"

    print("KERNEL_OK")
</pallas_src>

<mosaic_0001>
module attributes {stable_mosaic.version = 11 : i64} {
  func.func @_encoder_layer_kernel(%arg0: memref<16x32xf32, #tpu.memory_space<vmem>>, %arg1: memref<16x17xf32, #tpu.memory_space<vmem>>, %arg2: memref<120x112xf32, #tpu.memory_space<vmem>>, %arg3: memref<16x32xf32, #tpu.memory_space<vmem>>, %arg4: memref<32x8xf32, #tpu.memory_space<vmem>>, %arg5: memref<16x16xf32, #tpu.memory_space<vmem>>) attributes {dimension_semantics = [], scalar_prefetch = 0 : i64, scratch_operands = 1 : i64, tpu.core_type = #tpu.core_type<tc>} {
    %c0 = arith.constant 0 : index
    %c0_0 = arith.constant 0 : index
    %0 = vector.load %arg0[%c0, %c0_0] : memref<16x32xf32, #tpu.memory_space<vmem>>, vector<16x32xf32>
    %c0_1 = arith.constant 0 : index
    %c0_2 = arith.constant 0 : index
    %1 = vector.load %arg1[%c0_1, %c0_2] : memref<16x17xf32, #tpu.memory_space<vmem>>, vector<16x16xf32>
    %c0_3 = arith.constant 0 : index
    %c16 = arith.constant 16 : index
    %2 = vector.load %arg1[%c0_3, %c16] : memref<16x17xf32, #tpu.memory_space<vmem>>, vector<16x1xf32>
    %c0_4 = arith.constant 0 : index
    %c0_5 = arith.constant 0 : index
    %3 = vector.load %arg2[%c0_4, %c0_5] : memref<120x112xf32, #tpu.memory_space<vmem>>, vector<32x48xf32>
    %c0_6 = arith.constant 0 : index
    %c48 = arith.constant 48 : index
    %4 = vector.load %arg2[%c0_6, %c48] : memref<120x112xf32, #tpu.memory_space<vmem>>, vector<32x64xf32>
    %c32 = arith.constant 32 : index
    %c0_7 = arith.constant 0 : index
    %5 = vector.load %arg2[%c32, %c0_7] : memref<120x112xf32, #tpu.memory_space<vmem>>, vector<16x32xf32>
    %c48_8 = arith.constant 48 : index
    %c0_9 = arith.constant 0 : index
    %6 = vector.load %arg2[%c48_8, %c0_9] : memref<120x112xf32, #tpu.memory_space<vmem>>, vector<64x32xf32>
    %c112 = arith.constant 112 : index
    %c0_10 = arith.constant 0 : index
    %7 = vector.load %arg2[%c112, %c0_10] : memref<120x112xf32, #tpu.memory_space<vmem>>, vector<1x48xf32>
    %c113 = arith.constant 113 : index
    %c0_11 = arith.constant 0 : index
    %8 = vector.load %arg2[%c113, %c0_11] : memref<120x112xf32, #tpu.memory_space<vmem>>, vector<1x64xf32>
    %c114 = arith.constant 114 : index
    %c0_12 = arith.constant 0 : index
    %9 = vector.load %arg2[%c114, %c0_12] : memref<120x112xf32, #tpu.memory_space<vmem>>, vector<1x32xf32>
    %c115 = arith.constant 115 : index
    %c0_13 = arith.constant 0 : index
    %10 = vector.load %arg2[%c115, %c0_13] : memref<120x112xf32, #tpu.memory_space<vmem>>, vector<1x32xf32>
    %c116 = arith.constant 116 : index
    %c0_14 = arith.constant 0 : index
    %11 = vector.load %arg2[%c116, %c0_14] : memref<120x112xf32, #tpu.memory_space<vmem>>, vector<1x32xf32>
    %c117 = arith.constant 117 : index
    %c0_15 = arith.constant 0 : index
    %12 = vector.load %arg2[%c117, %c0_15] : memref<120x112xf32, #tpu.memory_space<vmem>>, vector<1x32xf32>
    %c118 = arith.constant 118 : index
    %c0_16 = arith.constant 0 : index
    %13 = vector.load %arg2[%c118, %c0_16] : memref<120x112xf32, #tpu.memory_space<vmem>>, vector<1x32xf32>
    %c119 = arith.constant 119 : index
    %c0_17 = arith.constant 0 : index
    %14 = vector.load %arg2[%c119, %c0_17] : memref<120x112xf32, #tpu.memory_space<vmem>>, vector<1x32xf32>
    %cst = arith.constant dense<0.000000e+00> : vector<16x48xf32>
    %15 = tpu.matmul %0, %3, %cst {dimension_numbers = #tpu.dot_dimension_numbers<[1], [0], [0], [1], [0, 0, 1, 1], [], []>} : vector<16x32xf32>, vector<32x48xf32>, vector<16x48xf32> -> vector<16x48xf32>
    %16 = vector.broadcast %7 : vector<1x48xf32> to vector<16x48xf32>
    %17 = arith.addf %15, %16 : vector<16x48xf32>
    %18 = vector.extract_strided_slice %17 {offsets = [0, 0], sizes = [16, 16], strides = [1, 1]} : vector<16x48xf32> to vector<16x16xf32>
    %19 = vector.extract_strided_slice %17 {offsets = [0, 16], sizes = [16, 16], strides = [1, 1]} : vector<16x48xf32> to vector<16x16xf32>
    %20 = vector.extract_strided_slice %17 {offsets = [0, 32], sizes = [16, 16], strides = [1, 1]} : vector<16x48xf32> to vector<16x16xf32>
    %21 = vector.extract_strided_slice %18 {offsets = [0, 0], sizes = [16, 8], strides = [1, 1]} : vector<16x16xf32> to vector<16x8xf32>
    %22 = vector.extract_strided_slice %19 {offsets = [0, 0], sizes = [16, 8], strides = [1, 1]} : vector<16x16xf32> to vector<16x8xf32>
    %23 = vector.extract_strided_slice %20 {offsets = [0, 0], sizes = [16, 8], strides = [1, 1]} : vector<16x16xf32> to vector<16x8xf32>
    "tpu.trace_start"() <{level = 10 : i32, message = "nd,md->nm"}> : () -> ()
    %cst_18 = arith.constant dense<0.000000e+00> : vector<16x16xf32>
    %24 = tpu.matmul %21, %22, %cst_18 {dimension_numbers = #tpu.dot_dimension_numbers<[1], [1], [0], [0], [0, 0, 1, 0], [], []>} : vector<16x8xf32>, vector<16x8xf32>, vector<16x16xf32> -> vector<16x16xf32>
    "tpu.trace_stop"() : () -> ()
    %cst_19 = arith.constant 0.353553385 : f32
    %25 = vector.broadcast %cst_19 : f32 to vector<16x16xf32>
    %26 = arith.mulf %24, %25 : vector<16x16xf32>
    %27 = arith.addf %26, %1 : vector<16x16xf32>
    %cst_20 = arith.constant dense<0xFF800000> : vector<16xf32>
    %28 = vector.multi_reduction <maximumf>, %27, %cst_20 [1] : vector<16x16xf32> to vector<16xf32>
    %29 = vector.shape_cast %28 : vector<16xf32> to vector<16x1xf32>
    %30 = vector.broadcast %29 : vector<16x1xf32> to vector<16x16xf32>
    %31 = arith.subf %27, %30 : vector<16x16xf32>
    %32 = math.exp %31 : vector<16x16xf32>
    %cst_21 = arith.constant dense<0.000000e+00> : vector<16xf32>
    %33 = vector.multi_reduction <add>, %32, %cst_21 [1] : vector<16x16xf32> to vector<16xf32>
    %34 = vector.shape_cast %33 : vector<16xf32> to vector<16x1xf32>
    %35 = vector.broadcast %34 : vector<16x1xf32> to vector<16x16xf32>
    %36 = arith.divf %32, %35 : vector<16x16xf32>
    %37 = vector.extract_strided_slice %36 {offsets = [0, 0], sizes = [16, 8], strides = [1, 1]} : vector<16x16xf32> to vector<16x8xf32>
    %38 = vector.extract_strided_slice %36 {offsets = [0, 8], sizes = [16, 8], strides = [1, 1]} : vector<16x16xf32> to vector<16x8xf32>
    %39 = arith.addf %37, %38 : vector<16x8xf32>
    %cst_22 = arith.constant dense<0.000000e+00> : vector<16x8xf32>
    %40 = tpu.matmul %36, %23, %cst_22 {dimension_numbers = #tpu.dot_dimension_numbers<[1], [0], [0], [1], [0, 0, 1, 1], [], []>} : vector<16x16xf32>, vector<16x8xf32>, vector<16x8xf32> -> vector<16x8xf32>
    %c0_23 = arith.constant 0 : index
    %c0_24 = arith.constant 0 : index
    %41 = vector.load %arg5[%c0_23, %c0_24] : memref<16x16xf32, #tpu.memory_space<vmem>>, vector<16x8xf32>
    tpu.vector_store %arg5[%c0_23, %c0_24], %40 {strides = array<i32>} : memref<16x16xf32, #tpu.memory_space<vmem>>, vector<16x8xf32>,
    %42 = vector.extract_strided_slice %18 {offsets = [0, 8], sizes = [16, 8], strides = [1, 1]} : vector<16x16xf32> to vector<16x8xf32>
    %43 = vector.extract_strided_slice %19 {offsets = [0, 8], sizes = [16, 8], strides = [1, 1]} : vector<16x16xf32> to vector<16x8xf32>
    %44 = vector.extract_strided_slice %20 {offsets = [0, 8], sizes = [16, 8], strides = [1, 1]} : vector<16x16xf32> to vector<16x8xf32>
    "tpu.trace_start"() <{level = 10 : i32, message = "nd,md->nm"}> : () -> ()
    %cst_25 = arith.constant dense<0.000000e+00> : vector<16x16xf32>
    %45 = tpu.matmul %42, %43, %cst_25 {dimension_numbers = #tpu.dot_dimension_numbers<[1], [1], [0], [0], [0, 0, 1, 0], [], []>} : vector<16x8xf32>, vector<16x8xf32>, vector<16x16xf32> -> vector<16x16xf32>
    "tpu.trace_stop"() : () -> ()
    %cst_26 = arith.constant 0.353553385 : f32
    %46 = vector.broadcast %cst_26 : f32 to vector<16x16xf32>
    %47 = arith.mulf %45, %46 : vector<16x16xf32>
    %48 = arith.addf %47, %1 : vector<16x16xf32>
    %cst_27 = arith.constant dense<0xFF800000> : vector<16xf32>
    %49 = vector.multi_reduction <maximumf>, %48, %cst_27 [1] : vector<16x16xf32> to vector<16xf32>
    %50 = vector.shape_cast %49 : vector<16xf32> to vector<16x1xf32>
    %51 = vector.broadcast %50 : vector<16x1xf32> to vector<16x16xf32>
    %52 = arith.subf %48, %51 : vector<16x16xf32>
    %53 = math.exp %52 : vector<16x16xf32>
    %cst_28 = arith.constant dense<0.000000e+00> : vector<16xf32>
    %54 = vector.multi_reduction <add>, %53, %cst_28 [1] : vector<16x16xf32> to vector<16xf32>
    %55 = vector.shape_cast %54 : vector<16xf32> to vector<16x1xf32>
    %56 = vector.broadcast %55 : vector<16x1xf32> to vector<16x16xf32>
    %57 = arith.divf %53, %56 : vector<16x16xf32>
    %58 = vector.extract_strided_slice %57 {offsets = [0, 0], sizes = [16, 8], strides = [1, 1]} : vector<16x16xf32> to vector<16x8xf32>
    %59 = vector.extract_strided_slice %57 {offsets = [0, 8], sizes = [16, 8], strides = [1, 1]} : vector<16x16xf32> to vector<16x8xf32>
    %60 = arith.addf %58, %59 : vector<16x8xf32>
    %cst_29 = arith.constant dense<0.000000e+00> : vector<16x8xf32>
    %61 = tpu.matmul %57, %44, %cst_29 {dimension_numbers = #tpu.dot_dimension_numbers<[1], [0], [0], [1], [0, 0, 1, 1], [], []>} : vector<16x16xf32>, vector<16x8xf32>, vector<16x8xf32> -> vector<16x8xf32>
    %c0_30 = arith.constant 0 : index
    %c8 = arith.constant 8 : index
    %62 = vector.load %arg5[%c0_30, %c8] : memref<16x16xf32, #tpu.memory_space<vmem>>, vector<16x8xf32>
    tpu.vector_store %arg5[%c0_30, %c8], %61 {strides = array<i32>} : memref<16x16xf32, #tpu.memory_space<vmem>>, vector<16x8xf32>,
    %63 = tpu.concatenate %39, %60 in 0 : vector<16x8xf32>, vector<16x8xf32> -> vector<32x8xf32>
    %c0_31 = arith.constant 0 : index
    %c0_32 = arith.constant 0 : index
    %64 = vector.load %arg4[%c0_31, %c0_32] : memref<32x8xf32, #tpu.memory_space<vmem>>, vector<32x8xf32>
    tpu.vector_store %arg4[%c0_31, %c0_32], %63 {strides = array<i32>} : memref<32x8xf32, #tpu.memory_space<vmem>>, vector<32x8xf32>,
    %c0_33 = arith.constant 0 : index
    %c0_34 = arith.constant 0 : index
    %65 = vector.load %arg5[%c0_33, %c0_34] : memref<16x16xf32, #tpu.memory_space<vmem>>, vector<16x16xf32>
    %cst_35 = arith.constant dense<0.000000e+00> : vector<16x32xf32>
    %66 = tpu.matmul %65, %5, %cst_35 {dimension_numbers = #tpu.dot_dimension_numbers<[1], [0], [0], [1], [0, 0, 1, 1], [], []>} : vector<16x16xf32>, vector<16x32xf32>, vector<16x32xf32> -> vector<16x32xf32>
    %67 = vector.broadcast %9 : vector<1x32xf32> to vector<16x32xf32>
    %68 = arith.addf %66, %67 : vector<16x32xf32>
    %69 = arith.addf %68, %0 : vector<16x32xf32>
    %cst_36 = arith.constant dense<0.000000e+00> : vector<16xf32>
    %70 = vector.multi_reduction <add>, %69, %cst_36 [1] : vector<16x32xf32> to vector<16xf32>
    %71 = vector.shape_cast %70 : vector<16xf32> to vector<16x1xf32>
    %cst_37 = arith.constant 3.200000e+01 : f32
    %72 = vector.broadcast %cst_37 : f32 to vector<16x1xf32>
    %73 = arith.divf %71, %72 : vector<16x1xf32>
    %74 = vector.broadcast %73 : vector<16x1xf32> to vector<16x32xf32>
    %75 = arith.subf %69, %74 : vector<16x32xf32>
    %76 = arith.mulf %75, %75 : vector<16x32xf32>
    %cst_38 = arith.constant dense<0.000000e+00> : vector<16xf32>
    %77 = vector.multi_reduction <add>, %76, %cst_38 [1] : vector<16x32xf32> to vector<16xf32>
    %78 = vector.shape_cast %77 : vector<16xf32> to vector<16x1xf32>
    %cst_39 = arith.constant 3.200000e+01 : f32
    %79 = vector.broadcast %cst_39 : f32 to vector<16x1xf32>
    %80 = arith.divf %78, %79 : vector<16x1xf32>
    %81 = vector.broadcast %73 : vector<16x1xf32> to vector<16x32xf32>
    %82 = arith.subf %69, %81 : vector<16x32xf32>
    %cst_40 = arith.constant 9.99999974E-6 : f32
    %83 = vector.broadcast %cst_40 : f32 to vector<16x1xf32>
    %84 = arith.addf %80, %83 : vector<16x1xf32>
    %85 = math.rsqrt %84 : vector<16x1xf32>
    %86 = vector.broadcast %85 : vector<16x1xf32> to vector<16x32xf32>
    %87 = arith.mulf %82, %86 : vector<16x32xf32>
    %88 = vector.broadcast %10 : vector<1x32xf32> to vector<16x32xf32>
    %89 = arith.mulf %87, %88 : vector<16x32xf32>
    %90 = vector.broadcast %11 : vector<1x32xf32> to vector<16x32xf32>
    %91 = arith.addf %89, %90 : vector<16x32xf32>
    %92 = vector.broadcast %2 : vector<16x1xf32> to vector<16x32xf32>
    %93 = arith.mulf %91, %92 : vector<16x32xf32>
    %cst_41 = arith.constant dense<0.000000e+00> : vector<16x64xf32>
    %94 = tpu.matmul %93, %4, %cst_41 {dimension_numbers = #tpu.dot_dimension_numbers<[1], [0], [0], [1], [0, 0, 1, 1], [], []>} : vector<16x32xf32>, vector<32x64xf32>, vector<16x64xf32> -> vector<16x64xf32>
    %95 = vector.broadcast %8 : vector<1x64xf32> to vector<16x64xf32>
    %96 = arith.addf %94, %95 : vector<16x64xf32>
    %cst_42 = arith.constant 0.000000e+00 : f32
    %97 = vector.broadcast %cst_42 : f32 to vector<16x64xf32>
    %98 = arith.maximumf %96, %97 : vector<16x64xf32>
    %cst_43 = arith.constant dense<0.000000e+00> : vector<16x32xf32>
    %99 = tpu.matmul %98, %6, %cst_43 {dimension_numbers = #tpu.dot_dimension_numbers<[1], [0], [0], [1], [0, 0, 1, 1], [], []>} : vector<16x64xf32>, vector<64x32xf32>, vector<16x32xf32> -> vector<16x32xf32>
    %100 = vector.broadcast %12 : vector<1x32xf32> to vector<16x32xf32>
    %101 = arith.addf %99, %100 : vector<16x32xf32>
    %102 = arith.addf %101, %93 : vector<16x32xf32>
    %cst_44 = arith.constant dense<0.000000e+00> : vector<16xf32>
    %103 = vector.multi_reduction <add>, %102, %cst_44 [1] : vector<16x32xf32> to vector<16xf32>
    %104 = vector.shape_cast %103 : vector<16xf32> to vector<16x1xf32>
    %cst_45 = arith.constant 3.200000e+01 : f32
    %105 = vector.broadcast %cst_45 : f32 to vector<16x1xf32>
    %106 = arith.divf %104, %105 : vector<16x1xf32>
    %107 = vector.broadcast %106 : vector<16x1xf32> to vector<16x32xf32>
    %108 = arith.subf %102, %107 : vector<16x32xf32>
    %109 = arith.mulf %108, %108 : vector<16x32xf32>
    %cst_46 = arith.constant dense<0.000000e+00> : vector<16xf32>
    %110 = vector.multi_reduction <add>, %109, %cst_46 [1] : vector<16x32xf32> to vector<16xf32>
    %111 = vector.shape_cast %110 : vector<16xf32> to vector<16x1xf32>
    %cst_47 = arith.constant 3.200000e+01 : f32
    %112 = vector.broadcast %cst_47 : f32 to vector<16x1xf32>
    %113 = arith.divf %111, %112 : vector<16x1xf32>
    %114 = vector.broadcast %106 : vector<16x1xf32> to vector<16x32xf32>
    %115 = arith.subf %102, %114 : vector<16x32xf32>
    %cst_48 = arith.constant 9.99999974E-6 : f32
    %116 = vector.broadcast %cst_48 : f32 to vector<16x1xf32>
    %117 = arith.addf %113, %116 : vector<16x1xf32>
    %118 = math.rsqrt %117 : vector<16x1xf32>
    %119 = vector.broadcast %118 : vector<16x1xf32> to vector<16x32xf32>
    %120 = arith.mulf %115, %119 : vector<16x32xf32>
    %121 = vector.broadcast %13 : vector<1x32xf32> to vector<16x32xf32>
    %122 = arith.mulf %120, %121 : vector<16x32xf32>
    %123 = vector.broadcast %14 : vector<1x32xf32> to vector<16x32xf32>
    %124 = arith.addf %122, %123 : vector<16x32xf32>
    %125 = vector.broadcast %2 : vector<16x1xf32> to vector<16x32xf32>
    %126 = arith.mulf %124, %125 : vector<16x32xf32>
    %c0_49 = arith.constant 0 : index
    %c0_50 = arith.constant 0 : index
    %127 = vector.load %arg3[%c0_49, %c0_50] : memref<16x32xf32, #tpu.memory_space<vmem>>, vector<16x32xf32>
    tpu.vector_store %arg3[%c0_49, %c0_50], %126 {strides = array<i32>} : memref<16x32xf32, #tpu.memory_space<vmem>>, vector<16x32xf32>,
    return
  }
}

</mosaic_0001>

<bundles_post_ra>
// kernel: tpu_custom_call.1
= control target key start
LH: loop header
LB: loop body
LE: loop exit
PB: predicated region body
PF: predicated region fallthrough
CT: control target
= control target key end

     0   :  { %vm44_vm0 = vcmask 261120   ;;  %s1027_s0 = inlined_call_operand.vmem [shape: f32[16,32], index: 0, kind: input, shape index: {}]   ;;  %s1028_s1 = inlined_call_operand.vmem [shape: f32[16,17], index: 1, kind: input, shape index: {}]   ;;  %s1029_s2 = inlined_call_operand.vmem [shape: f32[120,112], index: 2, kind: input, shape index: {}]   ;;  %s1030_s3 = inlined_call_operand.hbm [shape: f32[16,32], index: 3, kind: output, shape index: {0}]   ;;  %s1031_s4 = inlined_call_operand.vmem [shape: f32[32,8], index: 4, kind: output, shape index: {1}]  }
   0x1   :  { %v771_v0 = vld [vmem:[%s1029_s2 + $0x18] sm:$0xff]  ;;  %v776_v1 = vld [vmem:[%s1029_s2 + $0x10] sm:$0xff]  ;;  %v784_v3 = vld [vmem:[%s1029_s2 + $0x8] sm:$0xff] }
   0x2   :  { %63 = vmatpush.msra.mxu0 %v771_v0  ;;  %v660_v2 = vpack.i.bf16 %v776_v1, %v771_v0  ;;  %v789_v4 = vld [vmem:[%s1029_s2] sm:$0xff] }
   0x3   :  { %v665_v5 = vpack.i.bf16 %v789_v4, %v784_v3  ;;  %v798_v6 = vld [vmem:[%s1027_s0] sm:$0xff] }
   0x4   :  { %64 = vmatpush.msra.mxu0 %v776_v1 }
   0x6   :  { %65 = vmatpush.msra.mxu0 %v784_v3 }
   0x7   :  { %10 = vsyncpa [#allocation4], 0  ;;  %v806_v7 = vld [vmem:[%s1027_s0 + $0x8] sm:$0xff]  ;;  %v672_v8 = vld [vmem:[%s1029_s2 + $0x70] ss:$0 sm:$0xff]  ;;  %s732_s29 = smov 120  }
   0x8   :  { %66 = vmatpush.msra.mxu0 %v789_v4  ;;  %s733_s30 = smov 104   ;;  %s734_s0 = smov 112   ;;  %vm80_vm1 = vcmask 64512   ;;  %v838_v20 = vld [vmem:[%s1028_s1] sm:$0xff]  ;;  %vm116_vm2 = vcmask 130048   ;;  %v845_v27 = vld [vmem:[%s1028_s1 + $0x8] sm:$0xff] }
   0x9   :  { %619 = vmatmul.msk.f32.vlgmr.msra.gmra.mxu0 %vm44_vm0, %v798_v6  ;;  %s735_s1 = smov 96   ;;  %s736_s9 = smov 88   ;;  %v33_v3 = vld [vmem:[%s1029_s2 + $0x60] sm:$0xff] }
   0xa   :  { %s737_s12 = smov 8   ;;  %s738_s17 = smov 80  }
   0xb   :  { %s603_s26 = sshll.u32 %s1030_s3, 4  ;;  %s741_s27 = smov [#allocation3]   ;;  %s604_s26 = int_to_ptr.hbm [resolvable:$true] %s603_s26 }
   0xc   :  { %s601_s28 = sshll.u32 %s741_s27, 4  ;;  %s742_s5 = smov 128   ;;  %s602_s28 = int_to_ptr.vmem [resolvable:$true] %s601_s28 }
  0x11   :  { %620 = vmatmul.msk.f32.gmra.mxu0 %vm44_vm0, %v806_v7 }
  0x86   :  { %v68_v9 = vpop.f32.mrf.mxu0 }
  0x87   :  { %v813_v10 = vadd.f32 %v672_v8, %v68_v9 }
  0x89   :  { %210 = vrot.lane.b32.xlu2 %v813_v10, %s732_s29 }
  0x8e   :  { %v71_v11 = vpop.f32.mrf.mxu0 }
  0x8f   :  { %v817_v12 = vadd.f32 %v672_v8, %v71_v11 }
  0x91   :  { %216 = vrot.lane.b32.xlu1 %v817_v12, %s733_s30  ;;  %78 = vrot.lane.b32.xlu0 %v817_v12, %s734_s0  ;;  %v650_v57 = vpack.i.bf16 %v813_v10, %v817_v12 }
  0x92   :  { %212 = vrot.lane.b32.xlu2 %v817_v12, %s732_s29 }
  0x99   :  { %214 = vrot.lane.b32.xlu1 %v813_v10, %s733_s30  ;;  %76 = vrot.lane.b32.xlu0 %v813_v10, %s734_s0 }
  0xe3   :  { %v211_v17 = vpop.permute.xlu2 %210 }
  0xec   :  { %v213_v18 = vpop.permute.xlu2 %212 }
 0x103   :  { %v217_v13 = vpop.permute.xlu1 %216  ;;  %v79_v14 = vpop.permute.xlu0 %78 }
 0x104   :  { %621 = vmatpush.xpose.msk.msra.mxu1 %vm80_vm1, %v79_v14  ;;  %627 = vmatpush.xpose.msk.msra.mxu3 %vm80_vm1, %v217_v13 }
 0x10b   :  { %v215_v15 = vpop.permute.xlu1 %214  ;;  %v77_v16 = vpop.permute.xlu0 %76 }
 0x10c   :  { %622 = vmatpush.xpose.msk.msra.mxu1 %vm80_vm1, %v77_v16  ;;  %628 = vmatpush.xpose.msk.msra.mxu3 %vm80_vm1, %v215_v15 }
 0x10f   :  { %623 = vmatmul.msk.f32.vlgmr.msra.gmra.mxu1 %vm80_vm1, %v813_v10  ;;  %629 = vmatmul.msk.f32.vlgmr.msra.gmra.mxu3 %vm80_vm1, %v211_v17 }
 0x117   :  { %624 = vmatmul.msk.f32.gmra.mxu1 %vm80_vm1, %v817_v12  ;;  %630 = vmatmul.msk.f32.gmra.mxu3 %vm80_vm1, %v213_v18 }
 0x18c   :  { %v106_v19 = vpop.f32.mrf.mxu1 }
 0x18d   :  { %v112_v21 = vmul.f32 0.35355338, %v106_v19 }
 0x18f   :  { %v114_v22 = vadd.f32 %v112_v21, %v838_v20 }
 0x191   :  { %v117_v23 = vsel %vm116_vm2, %v114_v22, -inf }
 0x192   :  { %v243_v24 = vpop.f32.mrf.mxu3  ;;  %118 = vmax.xlane.f32.xlu0 %v117_v23 }
 0x193   :  { %v249_v25 = vmul.f32 0.35355338, %v243_v24 }
 0x194   :  { %v109_v26 = vpop.f32.mrf.mxu1 }
 0x195   :  { %v113_v28 = vmul.f32 0.35355338, %v109_v26  ;;  %v251_v29 = vadd.f32 %v249_v25, %v838_v20 }
 0x197   :  { %v253_v30 = vsel %vm116_vm2, %v251_v29, -inf  ;;  %v115_v31 = vadd.f32 %v113_v28, %v845_v27 }
 0x198   :  { %254 = vmax.xlane.f32.xlu2 %v253_v30 }
 0x199   :  { %v120_v32 = vsel %vm116_vm2, %v115_v31, -inf }
 0x19a   :  { %v246_v33 = vpop.f32.mrf.mxu3  ;;  %121 = vmax.xlane.f32.xlu1 %v120_v32 }
 0x19b   :  { %v250_v34 = vmul.f32 0.35355338, %v246_v33 }
 0x19d   :  { %v252_v35 = vadd.f32 %v250_v34, %v845_v27 }
 0x19f   :  { %v256_v36 = vsel %vm116_vm2, %v252_v35, -inf }
 0x1a0   :  { %257 = vmax.xlane.f32.xlu2 %v256_v36 }
 0x205   :  { %v119_v37 = vpop.xlane.xlu0 %118 }
 0x206   :  { %v123_v38 = vsub.f32 %v114_v22, %v119_v37 }
 0x208   :  { %v125_v39 = vmul.f32 1.442695, %v123_v38 }
 0x20a   :  { %680 = vpow2.f32 %v125_v39 }
 0x20b   :  { %v255_v40 = vpop.xlane.xlu2 %254 }
 0x20c   :  { %v259_v41 = vsub.f32 %v251_v29, %v255_v40 }
 0x20d   :  { %v122_v42 = vpop.xlane.xlu1 %121 }
 0x20e   :  { %v261_v43 = vmul.f32 1.442695, %v259_v41  ;;  %v124_v44 = vsub.f32 %v115_v31, %v122_v42 }
 0x210   :  { %v853_v45 = vpop.eup %680  ;;  %682 = vpow2.f32 %v261_v43  ;;  %v127_v46 = vmul.f32 1.442695, %v124_v44 }
 0x211   :  { %v129_v47 = vsel %vm116_vm2, %v853_v45, 0.0 }
 0x212   :  { %684 = vpow2.f32 %v127_v46  ;;  %130 = vadd.xlane.f32.xlu0 %v129_v47 }
 0x213   :  { %v258_v48 = vpop.xlane.xlu2 %257 }
 0x214   :  { %v260_v49 = vsub.f32 %v252_v35, %v258_v48 }
 0x216   :  { %v857_v50 = vpop.eup %682  ;;  %v263_v51 = vmul.f32 1.442695, %v260_v49 }
 0x217   :  { %v265_v52 = vsel %vm116_vm2, %v857_v50, 0.0 }
 0x218   :  { %v861_v53 = vpop.eup %684  ;;  %686 = vpow2.f32 %v263_v51  ;;  %266 = vadd.xlane.f32.xlu2 %v265_v52 }
 0x219   :  { %v132_v54 = vsel %vm116_vm2, %v861_v53, 0.0 }
 0x21a   :  { %133 = vadd.xlane.f32.xlu1 %v132_v54 }
 0x21e   :  { %v865_v55 = vpop.eup %686 }
 0x21f   :  { %v268_v56 = vsel %vm116_vm2, %v865_v55, 0.0 }
 0x222   :  { %269 = vadd.xlane.f32.xlu1 %v268_v56 }
 0x226   :  { %651 = vrot.lane.b32.xlu0 %v650_v57, %s735_s1 }
 0x230   :  { %656 = vrot.lane.b32.xlu2 %v650_v57, %s736_s9 }
 0x285   :  { %v131_v58 = vpop.xlane.xlu0 %130 }
 0x286   :  { %688 = vrcp.f32 %v131_v58  ;;  %v146_v11 = vand.u32 2147483648, %v131_v58  ;;  %vm140_vm4 = vweird.f32 %v131_v58  ;;  %v144_v13 = vand.u32 2147483647, %v131_v58 }
 0x288   :  { %v147_v18 = vor.u32 1.1754944e-38, %v146_v11  ;;  %vm145_vm6 = vcmp.eq.f32.partialorder %v144_v13, 8.507059e+37 }
 0x28b   :  { %v871_v59 = vpop.xlane.xlu2 %266 }
 0x28c   :  { %v689_v60 = vpop.eup %688  ;;  %690 = vrcp.f32 %v871_v59  ;;  %v282_v43 = vand.u32 2147483648, %v871_v59  ;;  %vm276_vm12 = vweird.f32 %v871_v59  ;;  %v280_v44 = vand.u32 2147483647, %v871_v59 }
 0x28d   :  { %v136_v61 = vmul.f32 %v689_v60, %v131_v58  ;;  %v134_v62 = vpop.xlane.xlu1 %133  ;;  %vm141_vm3 = vweird.f32 %v689_v60 }
 0x28e   :  { %692 = vrcp.f32 %v134_v62  ;;  %vm142_vm5 = vmor %vm140_vm4, %vm141_vm3  ;;  %v161_v28 = vand.u32 2147483648, %v134_v62  ;;  %vm155_vm8 = vweird.f32 %v134_v62  ;;  %v159_v33 = vand.u32 2147483647, %v134_v62 }
 0x28f   :  { %v137_v63 = vsub.f32 1.0, %v136_v61  ;;  %v283_v48 = vor.u32 1.1754944e-38, %v282_v43  ;;  %vm281_vm14 = vcmp.eq.f32.partialorder %v280_v44, 8.507059e+37 }
 0x290   :  { %v162_v38 = vor.u32 1.1754944e-38, %v161_v28  ;;  %vm160_vm10 = vcmp.eq.f32.partialorder %v159_v33, 8.507059e+37 }
 0x291   :  { %v138_v8 = vmul.f32 %v689_v60, %v137_v63  ;;  %v25_v63 = vld [vmem:[%s1029_s2 + $0x20] sm:$0xff] }
 0x292   :  { %v691_v9 = vpop.eup %690 }
 0x293   :  { %v139_v10 = vadd.f32 %v689_v60, %v138_v8  ;;  %v272_v16 = vmul.f32 %v691_v9, %v871_v59  ;;  %v657_v26 = vpop.permute.xlu2 %656  ;;  %vm277_vm11 = vweird.f32 %v691_v9 }
 0x294   :  { %v693_v12 = vpop.eup %692  ;;  %v658_v34 = vunpack.i.l.bf16 %v657_v26  ;;  %v659_v39 = vunpack.i.h.bf16 %v657_v26  ;;  %vm278_vm13 = vmor %vm276_vm12, %vm277_vm11 }
 0x295   :  { %v151_v14 = vmul.f32 %v693_v12, %v134_v62  ;;  %v270_v15 = vpop.xlane.xlu1 %269  ;;  %v143_v17 = vsel %vm142_vm5, %v689_v60, %v139_v10  ;;  %v273_v25 = vsub.f32 1.0, %v272_v16  ;;  %vm156_vm7 = vweird.f32 %v693_v12 }
 0x296   :  { %694 = vrcp.f32 %v270_v15  ;;  %v148_v24 = vsel %vm145_vm6, %v147_v18, %v143_v17  ;;  %vm157_vm9 = vmor %vm155_vm8, %vm156_vm7  ;;  %v297_v52 = vand.u32 2147483648, %v270_v15  ;;  %vm291_vm3 = vweird.f32 %v270_v15 }
 0x297   :  { %v152_v19 = vsub.f32 1.0, %v151_v14  ;;  %v876_v32 = vmul.f32 %v853_v45, %v148_v24  ;;  %v274_v35 = vmul.f32 %v691_v9, %v273_v25  ;;  %v295_v56 = vand.u32 2147483647, %v270_v15 }
 0x298   :  { %v652_v21 = vpop.permute.xlu0 %651  ;;  %v298_v57 = vor.u32 1.1754944e-38, %v297_v52  ;;  %vm352_vm6 = vcmask 130112  }
 0x299   :  { %v153_v22 = vmul.f32 %v693_v12, %v152_v19  ;;  %v653_v23 = vunpack.i.l.bf16 %v652_v21  ;;  %v654_v29 = vunpack.i.h.bf16 %v652_v21  ;;  %v275_v41 = vadd.f32 %v691_v9, %v274_v35 }
 0x29a   :  { %vm296_vm5 = vcmp.eq.f32.partialorder %v295_v56, 8.507059e+37 }
 0x29b   :  { %199 = vmatpush.msra.mxu2 %v653_v23  ;;  %v154_v30 = vadd.f32 %v693_v12, %v153_v22  ;;  %v279_v47 = vsel %vm278_vm13, %v691_v9, %v275_v41  ;;  %v739_v22 = vmov 32.0   ;;  %vm511_vm13 = vcmask 523264  }
 0x29c   :  { %v695_v31 = vpop.eup %694  ;;  %v284_v49 = vsel %vm281_vm14, %v283_v48, %v279_v47  ;;  %696 = vrcp.f32 %v739_v22  ;;  %v30_v48 = vld [vmem:[%s1029_s2 + $0x48] sm:$0xff] }
 0x29d   :  { %200 = vmatpush.msra.mxu2 %v654_v29  ;;  %v287_v36 = vmul.f32 %v695_v31, %v270_v15  ;;  %v158_v37 = vsel %vm157_vm9, %v693_v12, %v154_v30  ;;  %vm292_vm15 = vweird.f32 %v695_v31  ;;  %v889_v54 = vmul.f32 %v857_v50, %v284_v49  ;;  %v26_v50 = vld [vmem:[%s1029_s2 + $0x28] sm:$0xff]  ;;  %v673_v12 = vld [vmem:[%s1029_s2 + $0x72] ss:$0 sm:$0xff] }
 0x29e   :  { %625 = vmatmul.msk.f32.vlgmr.msra.gmra.mxu2 %vm116_vm2, %v876_v32  ;;  %v163_v40 = vsel %vm160_vm10, %v162_v38, %v158_v37  ;;  %vm293_vm4 = vmor %vm291_vm3, %vm292_vm15  ;;  %382 = vmatpush.msrb.mxu0 %v26_v50  ;;  %v740_v30 = vmov 16  }
 0x29f   :  { %335 = vmatpush.msrb.mxu2 %v658_v34  ;;  %v288_v42 = vsub.f32 1.0, %v287_v36  ;;  %v884_v45 = vmul.f32 %v861_v53, %v163_v40  ;;  %670 = vset.pattern.permute.xlu0 %v740_v30 }
 0x2a0   :  { %383 = vmatpush.msrb.mxu0 %v25_v63  ;;  %671 = vset.pattern.permute.xlu2 %v740_v30 }
 0x2a1   :  { %336 = vmatpush.msrb.mxu2 %v659_v39  ;;  %v289_v46 = vmul.f32 %v695_v31, %v288_v42  ;;  %v34_v42 = vld [vmem:[%s1029_s2 + $0x68] sm:$0xff] }
 0x2a2   :  { %v697_v23 = vpop.eup %696  ;;  %526 = vmatpush.msrb.mxu3 %v34_v42 }
 0x2a3   :  { %v290_v51 = vadd.f32 %v695_v31, %v289_v46  ;;  %v400_v24 = vmul.f32 32.0, %v697_v23  ;;  %v31_v46 = vld [vmem:[%s1029_s2 + $0x50] sm:$0xff] }
 0x2a4   :  { %527 = vmatpush.msrb.mxu3 %v33_v3 }
 0x2a5   :  { %v294_v53 = vsel %vm293_vm4, %v695_v31, %v290_v51 }
 0x2a6   :  { %626 = vmatmul.msk.f32.gmra.mxu2 %vm116_vm2, %v884_v45  ;;  %v299_v58 = vsel %vm296_vm5, %v298_v57, %v294_v53 }
 0x2a7   :  { %v894_v59 = vmul.f32 %v865_v55, %v299_v58  ;;  %v674_v58 = vld [vmem:[%s1029_s2 + $0x73] ss:$0 sm:$0xff] }
 0x2ae   :  { %631 = vmatmul.msk.f32.vlgmr.msrb.gmra.mxu2 %vm116_vm2, %v889_v54 }
 0x2b6   :  { %632 = vmatmul.msk.f32.gmra.mxu2 %vm116_vm2, %v894_v59 }
 0x321   :  { %v202_v60 = vpop.f32.mrf.mxu2 }
 0x322   :  { %208 = vst.msk [vmem:[#allocation2] sm:$0xff] %vm80_vm1, %v202_v60 }
 0x329   :  { %v205_v61 = vpop.f32.mrf.mxu2 }
 0x32a   :  { %209 = vst.msk [vmem:[#allocation2 + $0x8] sm:$0xff] %vm80_vm1, %v205_v61 }
 0x331   :  { %v338_v62 = vpop.f32.mrf.mxu2 }
 0x332   :  { %346 = vrot.lane.b32.xlu1 %v338_v62, %s737_s12  ;;  %v675_v62 = vld [vmem:[%s1029_s2 + $0x74] ss:$0 sm:$0xff] }
 0x339   :  { %v341_v55 = vpop.f32.mrf.mxu2 }
 0x33a   :  { %348 = vrot.lane.b32.xlu0 %v341_v55, %s737_s12 }
 0x3a4   :  { %v347_v8 = vpop.permute.xlu1 %346 }
 0x3a5   :  { %353 = vst.msk [vmem:[#allocation2] sm:$0xff] %vm352_vm6, %v347_v8 }
 0x3ac   :  { %v349_v9 = vpop.permute.xlu0 %348  ;;  %v359_v11 = vld [vmem:[#allocation2] sm:$0xff] }
 0x3ad   :  { %354 = vst.msk [vmem:[#allocation2 + $0x8] sm:$0xff] %vm352_vm6, %v349_v9  ;;  %633 = vmatmul.msk.f32.vlgmr.msrb.gmra.mxu0 %vm116_vm2, %v359_v11 }
 0x3b4   :  { %v360_v10 = vld [vmem:[#allocation2 + $0x8] sm:$0xff] }
 0x3b5   :  { %634 = vmatmul.msk.f32.gmra.mxu0 %vm116_vm2, %v360_v10  ;;  %vm404_vm2 = vweird.f32 %v697_v23 }
 0x42a   :  { %v385_v13 = vpop.f32.mrf.mxu0 }
 0x42b   :  { %v386_v14 = vadd.f32 %v673_v12, %v385_v13 }
 0x42d   :  { %v391_v15 = vadd.f32 %v386_v14, %v798_v6  ;;  %v401_v6 = vsub.f32 1.0, %v400_v24  ;;  %v28_v24 = vld [vmem:[%s1029_s2 + $0x38] sm:$0xff] }
 0x42f   :  { %v393_v16 = vsel %vm44_vm0, %v391_v15, 0.0  ;;  %v402_v25 = vmul.f32 %v697_v23, %v401_v6  ;;  %v27_v6 = vld [vmem:[%s1029_s2 + $0x30] sm:$0xff] }
 0x430   :  { %394 = vadd.xlane.f32.xlu0 %v393_v16 }
 0x431   :  { %v403_v26 = vadd.f32 %v697_v23, %v402_v25  ;;  %v676_v25 = vld [vmem:[%s1029_s2 + $0x71] ss:$0 sm:$0xff] }
 0x432   :  { %v388_v17 = vpop.f32.mrf.mxu0 }
 0x433   :  { %v389_v18 = vadd.f32 %v673_v12, %v388_v17  ;;  %v920_v28 = vsel %vm404_vm2, %v697_v23, %v403_v26  ;;  %v29_v23 = vld [vmem:[%s1029_s2 + $0x40] sm:$0xff] }
 0x435   :  { %v392_v19 = vadd.f32 %v389_v18, %v806_v7 }
 0x437   :  { %v396_v21 = vsel %vm44_vm0, %v392_v19, 0.0 }
 0x438   :  { %397 = vadd.xlane.f32.xlu2 %v396_v21 }
 0x450   :  { %661 = vrot.lane.b32.xlu2 %v660_v2, %s738_s17 }
 0x458   :  { %457 = vperm.xlu2 %671, %v845_v27  }
 0x4a3   :  { %v395_v29 = vpop.xlane.xlu0 %394 }
 0x4a4   :  { %v406_v7 = vmul.f32 %v920_v28, %v395_v29 }
 0x4a6   :  { %v408_v31 = vsub.f32 %v391_v15, %v406_v7 }
 0x4a8   :  { %v410_v0 = vmul.f32 %v408_v31, %v408_v31 }
 0x4aa   :  { %v412_v1 = vsel %vm44_vm0, %v410_v0, 0.0 }
 0x4ab   :  { %v398_v2 = vpop.xlane.xlu2 %397  ;;  %413 = vadd.xlane.f32.xlu1 %v412_v1  ;;  %v677_v1 = vld [vmem:[%s1029_s2 + $0x75] ss:$0 sm:$0xff] }
 0x4ac   :  { %v407_v33 = vmul.f32 %v920_v28, %v398_v2 }
 0x4ae   :  { %v409_v34 = vsub.f32 %v392_v19, %v407_v33 }
 0x4b0   :  { %v411_v35 = vmul.f32 %v409_v34, %v409_v34 }
 0x4b2   :  { %v415_v36 = vsel %vm44_vm0, %v411_v35, 0.0 }
 0x4b3   :  { %416 = vadd.xlane.f32.xlu0 %v415_v36  ;;  %v662_v37 = vpop.permute.xlu2 %661 }
 0x4b4   :  { %v663_v27 = vunpack.i.l.bf16 %v662_v37  ;;  %v664_v38 = vunpack.i.h.bf16 %v662_v37 }
 0x4b6   :  { %497 = vmatpush.msrb.mxu1 %v663_v27 }
 0x4b8   :  { %498 = vmatpush.msrb.mxu1 %v664_v38 }
 0x4bb   :  { %v958_v19 = vpop.permute.xlu2 %457 }
 0x4c4   :  { %666 = vrot.lane.b32.xlu1 %v665_v5, %s738_s17 }
 0x4c7   :  { %452 = vperm.xlu0 %670, %v838_v20   ;;  %v32_v20 = vld [vmem:[%s1029_s2 + $0x58] sm:$0xff] }
 0x4c8   :  { %528 = vmatpush.msrb.mxu3 %v32_v20 }
 0x4ca   :  { %529 = vmatpush.msrb.mxu3 %v31_v46 }
 0x4cc   :  { %530 = vmatpush.msrb.mxu3 %v30_v48 }
 0x4ce   :  { %531 = vmatpush.msrb.mxu3 %v29_v23 }
 0x4d0   :  { %532 = vmatpush.msrb.mxu3 %v28_v24 }
 0x4d2   :  { %533 = vmatpush.msrb.mxu3 %v27_v6 }
 0x51e   :  { %v414_v39 = vpop.xlane.xlu1 %413 }
 0x51f   :  { %v418_v40 = vmul.f32 %v414_v39, %v920_v28 }
 0x521   :  { %v420_v41 = vadd.f32 1e-05, %v418_v40 }
 0x523   :  { %698 = vrsqrt.f32 %v420_v41  ;;  %vm428_vm8 = vweird.f32 %v420_v41 }
 0x526   :  { %v417_v4 = vpop.xlane.xlu0 %416 }
 0x527   :  { %v419_v5 = vmul.f32 %v417_v4, %v920_v28 }
 0x529   :  { %v699_v43 = vpop.eup %698  ;;  %v421_v44 = vadd.f32 1e-05, %v419_v5 }
 0x52a   :  { %v423_v47 = vmul.f32 %v699_v43, %v420_v41  ;;  %vm429_vm7 = vweird.f32 %v699_v43 }
 0x52b   :  { %700 = vrsqrt.f32 %v421_v44  ;;  %vm430_vm9 = vmor %vm428_vm8, %vm429_vm7  ;;  %vm438_vm11 = vweird.f32 %v421_v44 }
 0x52c   :  { %v424_v49 = vmul.f32 %v699_v43, %v423_v47 }
 0x52e   :  { %v425_v51 = vmul.f32 0.5, %v424_v49 }
 0x530   :  { %v426_v52 = vsub.f32 1.5, %v425_v51 }
 0x531   :  { %v701_v56 = vpop.eup %700 }
 0x532   :  { %v427_v53 = vmul.f32 %v699_v43, %v426_v52  ;;  %v433_v57 = vmul.f32 %v701_v56, %v421_v44  ;;  %vm439_vm10 = vweird.f32 %v701_v56 }
 0x533   :  { %vm440_vm12 = vmor %vm438_vm11, %vm439_vm10 }
 0x534   :  { %v434_v50 = vmul.f32 %v701_v56, %v433_v57  ;;  %v431_v60 = vsel %vm430_vm9, %v699_v43, %v427_v53 }
 0x535   :  { %v442_v61 = vmul.f32 %v431_v60, %v408_v31 }
 0x536   :  { %v435_v55 = vmul.f32 0.5, %v434_v50  ;;  %v667_v63 = vpop.permute.xlu1 %666 }
 0x537   :  { %v668_v8 = vunpack.i.l.bf16 %v667_v63  ;;  %v445_v9 = vmul.f32 %v674_v58, %v442_v61  ;;  %v669_v11 = vunpack.i.h.bf16 %v667_v63 }
 0x538   :  { %v436_v10 = vsub.f32 1.5, %v435_v55 }
 0x539   :  { %499 = vmatpush.msrb.mxu1 %v668_v8  ;;  %v448_v12 = vadd.f32 %v675_v62, %v445_v9  ;;  %v954_v13 = vpop.permute.xlu0 %452 }
 0x53a   :  { %v437_v14 = vmul.f32 %v701_v56, %v436_v10 }
 0x53b   :  { %v460_v15 = vmul.f32 %v954_v13, %v448_v12  ;;  %500 = vmatpush.msrb.mxu1 %v669_v11  ;;  %v678_v11 = vld [vmem:[%s1029_s2 + $0x76] ss:$0 sm:$0xff]  ;;  %v679_v12 = vld [vmem:[%s1029_s2 + $0x77] ss:$0 sm:$0xff] }
 0x53c   :  { %v441_v16 = vsel %vm440_vm12, %v701_v56, %v437_v14 }
 0x53d   :  { %635 = vmatmul.msk.f32.vlgmr.msrb.gmra.mxu1 %vm44_vm0, %v460_v15  ;;  %v443_v17 = vmul.f32 %v441_v16, %v409_v34 }
 0x53f   :  { %v446_v18 = vmul.f32 %v674_v58, %v443_v17 }
 0x541   :  { %v449_v21 = vadd.f32 %v675_v62, %v446_v18 }
 0x543   :  { %v461_v22 = vmul.f32 %v958_v19, %v449_v21 }
 0x545   :  { %636 = vmatmul.msk.f32.gmra.mxu1 %vm44_vm0, %v461_v22 }
 0x5ba   :  { %v502_v26 = vpop.f32.mrf.mxu1 }
 0x5bb   :  { %v503_v29 = vadd.f32 %v676_v25, %v502_v26 }
 0x5bd   :  { %v508_v7 = vmax.f32 %v503_v29, 0.0 }
 0x5bf   :  { %637 = vmatmul.msk.f32.vlgmr.msrb.gmra.mxu3 %vm511_vm13, %v508_v7 }
 0x5c2   :  { %v505_v30 = vpop.f32.mrf.mxu1 }
 0x5c3   :  { %v506_v31 = vadd.f32 %v676_v25, %v505_v30 }
 0x5c5   :  { %v509_v0 = vmax.f32 %v506_v31, 0.0 }
 0x5c7   :  { %638 = vmatmul.msk.f32.gmra.mxu3 %vm511_vm13, %v509_v0 }
 0x642   :  { %v535_v2 = vpop.f32.mrf.mxu3 }
 0x643   :  { %v536_v33 = vadd.f32 %v677_v1, %v535_v2 }
 0x645   :  { %v541_v34 = vadd.f32 %v536_v33, %v460_v15 }
 0x647   :  { %v543_v35 = vsel %vm44_vm0, %v541_v34, 0.0 }
 0x648   :  { %544 = vadd.xlane.f32.xlu1 %v543_v35 }
 0x64a   :  { %v538_v36 = vpop.f32.mrf.mxu3 }
 0x64b   :  { %v539_v37 = vadd.f32 %v677_v1, %v538_v36 }
 0x64d   :  { %v542_v27 = vadd.f32 %v539_v37, %v461_v22 }
 0x64f   :  { %v546_v38 = vsel %vm44_vm0, %v542_v27, 0.0 }
 0x650   :  { %547 = vadd.xlane.f32.xlu2 %v546_v38 }
 0x668   :  { %167 = vrot.lane.b32.xlu2 %v876_v32, %s732_s29 }
 0x670   :  { %305 = vrot.lane.b32.xlu2 %v894_v59, %s732_s29 }
 0x6bb   :  { %v545_v39 = vpop.xlane.xlu1 %544 }
 0x6bc   :  { %v549_v40 = vmul.f32 %v545_v39, %v920_v28 }
 0x6be   :  { %v551_v41 = vsub.f32 %v541_v34, %v549_v40 }
 0x6c0   :  { %v553_v42 = vmul.f32 %v551_v41, %v551_v41 }
 0x6c2   :  { %v555_v3 = vsel %vm44_vm0, %v553_v42, 0.0 }
 0x6c3   :  { %v548_v4 = vpop.xlane.xlu2 %547  ;;  %556 = vadd.xlane.f32.xlu0 %v555_v3 }
 0x6c4   :  { %v550_v5 = vmul.f32 %v548_v4, %v920_v28 }
 0x6c6   :  { %v552_v20 = vsub.f32 %v542_v27, %v550_v5 }
 0x6c8   :  { %v554_v43 = vmul.f32 %v552_v20, %v552_v20 }
 0x6ca   :  { %v558_v44 = vsel %vm44_vm0, %v554_v43, 0.0 }
 0x6cb   :  { %v168_v46 = vpop.permute.xlu2 %167  ;;  %559 = vadd.xlane.f32.xlu1 %v558_v44 }
 0x6cc   :  { %v173_v47 = vadd.f32 %v168_v46, %v876_v32 }
 0x6ce   :  { %355 = vst.msk [vmem:[%s1031_s4] sm:$0xff] %vm80_vm1, %v173_v47 }
 0x6d3   :  { %v306_v48 = vpop.permute.xlu2 %305 }
 0x6d4   :  { %v310_v49 = vadd.f32 %v306_v48, %v894_v59 }
 0x6d6   :  { %358 = vst.msk [vmem:[%s1031_s4 + $0x18] sm:$0xff] %vm80_vm1, %v310_v49 }
 0x6d7   :  { %303 = vrot.lane.b32.xlu0 %v889_v54, %s732_s29 }
 0x6e4   :  { %169 = vrot.lane.b32.xlu1 %v884_v45, %s732_s29 }
 0x736   :  { %v557_v32 = vpop.xlane.xlu0 %556 }
 0x737   :  { %v561_v51 = vmul.f32 %v557_v32, %v920_v28 }
 0x739   :  { %v563_v52 = vadd.f32 1e-05, %v561_v51 }
 0x73b   :  { %702 = vrsqrt.f32 %v563_v52  ;;  %vm571_vm15 = vweird.f32 %v563_v52 }
 0x73e   :  { %v560_v56 = vpop.xlane.xlu1 %559 }
 0x73f   :  { %v562_v53 = vmul.f32 %v560_v56, %v920_v28 }
 0x741   :  { %v703_v59 = vpop.eup %702  ;;  %v564_v57 = vadd.f32 1e-05, %v562_v53 }
 0x742   :  { %v566_v58 = vmul.f32 %v703_v59, %v563_v52  ;;  %vm572_vm14 = vweird.f32 %v703_v59 }
 0x743   :  { %704 = vrsqrt.f32 %v564_v57  ;;  %vm573_vm3 = vmor %vm571_vm15, %vm572_vm14  ;;  %vm581_vm5 = vweird.f32 %v564_v57 }
 0x744   :  { %v567_v50 = vmul.f32 %v703_v59, %v566_v58 }
 0x746   :  { %v568_v60 = vmul.f32 0.5, %v567_v50 }
 0x748   :  { %v569_v61 = vsub.f32 1.5, %v568_v60 }
 0x749   :  { %v705_v62 = vpop.eup %704  ;;  %v304_v55 = vpop.permute.xlu0 %303 }
 0x74a   :  { %v570_v63 = vmul.f32 %v703_v59, %v569_v61  ;;  %v576_v8 = vmul.f32 %v705_v62, %v564_v57  ;;  %v309_v9 = vadd.f32 %v304_v55, %v889_v54  ;;  %vm582_vm4 = vweird.f32 %v705_v62 }
 0x74b   :  { %vm583_vm6 = vmor %vm581_vm5, %vm582_vm4 }
 0x74c   :  { %v574_v28 = vsel %vm573_vm3, %v703_v59, %v570_v63  ;;  %v577_v10 = vmul.f32 %v705_v62, %v576_v8  ;;  %357 = vst.msk [vmem:[%s1031_s4 + $0x10] sm:$0xff] %vm80_vm1, %v309_v9 }
 0x74d   :  { %v585_v14 = vmul.f32 %v574_v28, %v551_v41 }
 0x74e   :  { %v578_v15 = vmul.f32 0.5, %v577_v10 }
 0x74f   :  { %v588_v16 = vmul.f32 %v678_v11, %v585_v14 }
 0x750   :  { %v579_v54 = vsub.f32 1.5, %v578_v15 }
 0x751   :  { %v591_v17 = vadd.f32 %v679_v12, %v588_v16 }
 0x752   :  { %v580_v18 = vmul.f32 %v705_v62, %v579_v54 }
 0x753   :  { %v593_v21 = vmul.f32 %v591_v17, %v954_v13 }
 0x754   :  { %v584_v22 = vsel %vm583_vm6, %v705_v62, %v580_v18 }
 0x755   :  { %v586_v23 = vmul.f32 %v584_v22, %v552_v20  ;;  %595 = vst.msk [vmem:[#allocation3] sm:$0xff] %vm44_vm0, %v593_v21 }
 0x756   :  { %v170_v24 = vpop.permute.xlu1 %169 }
 0x757   :  { %v589_v6 = vmul.f32 %v678_v11, %v586_v23  ;;  %v174_v25 = vadd.f32 %v170_v24, %v884_v45 }
 0x759   :  { %v592_v26 = vadd.f32 %v679_v12, %v589_v6  ;;  %356 = vst.msk [vmem:[%s1031_s4 + $0x8] sm:$0xff] %vm80_vm1, %v174_v25 }
 0x75b   :  { %v594_v13 = vmul.f32 %v592_v26, %v958_v19 }
 0x75d   :  { %596 = vst.msk [vmem:[#allocation3 + $0x8] sm:$0xff] %vm44_vm0, %v594_v13 }
 0x75e   :  { %609 = dma.vmem_to_hbm [thread:$0]  %s602_s28, 256, %s604_s26, [#allocation4], %s742_s5, %s742_s5, %s737_s12  }
 0x75f   :  { %730 = dma.done.wait [#allocation4], 256  }
 0x760   :  { %731 = vsyncadd [#allocation4], 4294967040 }
 0x761   :  { %618 = vsyncpa [#allocation4], 1 }

</bundles_post_ra>
